<compile_context>
chip_gen: v5e
topology: v5e:2x2
jax: 0.10.0
libtpu: 0.0.40
codegen_flags: <defaults>
</compile_context>

<pallas_src>
import functools
import math

import jax
import jax.numpy as jnp
from jax.experimental import pallas as pl
from jax.experimental.pallas import tpu as pltpu


# ---------------------------------------------------------------------------
# Fused kernel: one batch image per grid step.
#   xs_ref : (1, Ho+1, Wo+1, 4*Cin) space-to-depth view of the zero-padded
#            input: xs[A,B,(p*2+q)*Cin+c] = x_pad[2A+p, 2B+q, c]
#   w1_ref : (16*Cin, 4*Cin)  conv1 weight rearranged so that
#            (4-slab im2col of xs) @ w1 directly yields the conv1 output for
#            all four phases, i.e. the SpaceToChannel'd feature map with
#            channel order s*Cin + c (s = i*2 + j); scale folded in.
#   b1_ref : (1, 4*Cin)       conv1 bias tiled over the 4 phases.
#   w2_ref : (36*Cin, Cout_pad) conv2 weight, input channels permuted to the
#            kernel's s*Cin+c order, flattened over (tap, channel), scale
#            folded in, output channels zero-padded to a multiple of 128.
#   b2_ref : (1, Cout_pad)
#   o_ref  : (1, Ho*Wo, Cout_pad)  lane-dense output slab.
#   zp_ref : (Ho+2, Wo+2, 4*Cin)   VMEM scratch: zero-padded conv2 input.
# ---------------------------------------------------------------------------
def _upscale_block_kernel(xs_ref, w1_ref, b1_ref, w2_ref, b2_ref, o_ref,
                          zp_ref, *, ho, wo, cin, slope):
    c2 = 4 * cin
    n = ho * wo

    xs = xs_ref[0]                                    # (Ho+1, Wo+1, 4*Cin)

    # --- conv1 (+ LeakyReLU) for all four output phases with ONE matmul. ---
    # The four (a, b) in {0,1}^2 slabs of the space-to-depth input jointly
    # cover the 4x4 neighbourhood that the 3x3 taps of every phase need.
    slabs = [xs[a:a + ho, b:b + wo, :].reshape(n, c2)
             for a in range(2) for b in range(2)]
    x4 = jnp.concatenate(slabs, axis=-1)              # (n, 16*Cin)
    z = jnp.dot(x4, w1_ref[...], preferred_element_type=jnp.float32)
    z = z + b1_ref[...]
    z = jnp.maximum(z, slope * z)                     # LeakyReLU(0.2)
    # z[m, s*Cin + c] == (conv1 -> SpaceToChannel) output; the channel
    # permutation vs. PyTorch's c*4 + s order is folded into w2 in the wrapper.

    # --- 'same' zero padding for conv2, entirely in VMEM scratch. ---
    zp_ref[...] = jnp.zeros(zp_ref.shape, zp_ref.dtype)
    zp_ref[1:ho + 1, 1:wo + 1, :] = z.reshape(ho, wo, c2)

    # --- conv2 (+ LeakyReLU): one im2col matmul, lane-dense padded output. ---
    taps = [zp_ref[dy:dy + ho, dx:dx + wo, :].reshape(n, c2)
            for dy in range(3) for dx in range(3)]
    p2 = jnp.concatenate(taps, axis=-1)               # (n, 36*Cin)
    y = jnp.dot(p2, w2_ref[...], preferred_element_type=jnp.float32)
    y = y + b2_ref[...]
    y = jnp.maximum(y, slope * y)                     # (n, Cout_pad)
    o_ref[0] = y.astype(o_ref.dtype)


# ---------------------------------------------------------------------------
# Wrapper-side weight / input preparation (pure layout plumbing, runs in XLA).
# ---------------------------------------------------------------------------
def kaiming_scale(fanin, activation_slope):
    return math.sqrt(2.0 / ((1.0 + activation_slope ** 2) * fanin))


def init_upscale_block_params(key, c_in, c_out):
    k1, k2 = jax.random.split(key)
    # Equalized init: weights ~ N(0, 1), biases = 0 (HWIO layout).
    w1 = jax.random.normal(k1, (3, 3, c_in, c_in), jnp.float32)
    b1 = jnp.zeros((c_in,), jnp.float32)
    w2 = jax.random.normal(k2, (3, 3, 4 * c_in, c_out), jnp.float32)
    b2 = jnp.zeros((c_out,), jnp.float32)
    return dict(w1=w1, b1=b1, scale1=kaiming_scale(c_in * 9, 0.2),
                w2=w2, b2=b2, scale2=kaiming_scale(4 * c_in * 9, 0.2))


def _prep_weights(params):
    """Fold equalized-lr scales into the weights and rearrange them into the
    single-matmul layouts consumed by the fused kernel."""
    cin = params["w1"].shape[2]
    cout = params["w2"].shape[3]
    w1 = params["w1"] * params["scale1"]              # (3,3,Cin,Cin)
    w2 = params["w2"] * params["scale2"]              # (3,3,4*Cin,Cout)

    # conv1: scatter the 3x3 taps of every output phase (i,j) into the
    # (16*Cin, 4*Cin) weight multiplying the 4-slab space-to-depth patch.
    w1x = jnp.zeros((16 * cin, 4 * cin), jnp.float32)
    for i in range(2):
        for j in range(2):
            col0 = (i * 2 + j) * cin
            for dy in range(3):
                for dx in range(3):
                    a, p = divmod(i + dy, 2)
                    b, q = divmod(j + dx, 2)
                    row0 = ((a * 2 + b) * 4 + (p * 2 + q)) * cin
                    w1x = w1x.at[row0:row0 + cin,
                                 col0:col0 + cin].set(w1[dy, dx])
    b1x = jnp.tile(params["b1"], 4).reshape(1, 4 * cin)

    # conv2: permute input channels from PyTorch's space-to-channel order
    # (c*4 + s) to the kernel's (s*Cin + c) order, flatten (tap, channel),
    # and zero-pad output channels to a lane-dense multiple of 128.
    perm = jnp.asarray([c * 4 + s for s in range(4) for c in range(cin)])
    w2k = jnp.take(w2, perm, axis=2)                  # (3,3,4*Cin,Cout)
    w2x = w2k.reshape(9 * 4 * cin, cout)
    cout_pad = ((cout + 127) // 128) * 128
    w2x = jnp.pad(w2x, ((0, 0), (0, cout_pad - cout)))
    b2x = jnp.pad(params["b2"], (0, cout_pad - cout)).reshape(1, cout_pad)
    return w1x, b1x, w2x, b2x, cout_pad


def _prep_input(x_nchw):
    """NCHW -> padded NHWC -> 2x2 space-to-depth (channel = (p*2+q)*Cin + c),
    so every in-kernel access is a contiguous static slice."""
    x = jnp.transpose(x_nchw, (0, 2, 3, 1))           # NHWC
    bsz, h, w, cin = x.shape
    xp = jnp.pad(x, ((0, 0), (1, 1), (1, 1), (0, 0)))
    hs, ws = (h + 2) // 2, (w + 2) // 2
    xs = xp.reshape(bsz, hs, 2, ws, 2, cin)
    xs = jnp.transpose(xs, (0, 1, 3, 2, 4, 5))
    return xs.reshape(bsz, hs, ws, 4 * cin)


def upscale_block_forward(x_nchw, params):
    bsz, cin, h, w = x_nchw.shape
    assert h % 2 == 0 and w % 2 == 0
    cout = params["w2"].shape[3]
    ho, wo = h // 2, w // 2

    xs = _prep_input(x_nchw)                          # (B, Ho+1, Wo+1, 4*Cin)
    w1x, b1x, w2x, b2x, cout_pad = _prep_weights(params)

    kernel = functools.partial(_upscale_block_kernel,
                               ho=ho, wo=wo, cin=cin, slope=0.2)
    out = pl.pallas_call(
        kernel,
        out_shape=jax.ShapeDtypeStruct((bsz, ho * wo, cout_pad), jnp.float32),
        grid_spec=pltpu.PrefetchScalarGridSpec(
            num_scalar_prefetch=0,
            grid=(bsz,),
            in_specs=[
                pl.BlockSpec((1, ho + 1, wo + 1, 4 * cin),
                             lambda b: (b, 0, 0, 0)),
                pl.BlockSpec((16 * cin, 4 * cin), lambda b: (0, 0)),
                pl.BlockSpec((1, 4 * cin), lambda b: (0, 0)),
                pl.BlockSpec((36 * cin, cout_pad), lambda b: (0, 0)),
                pl.BlockSpec((1, cout_pad), lambda b: (0, 0)),
            ],
            out_specs=pl.BlockSpec((1, ho * wo, cout_pad),
                                   lambda b: (b, 0, 0)),
            scratch_shapes=[
                pltpu.VMEM((ho + 2, wo + 2, 4 * cin), jnp.float32)],
        ),
        compiler_params=pltpu.CompilerParams(
            dimension_semantics=("parallel",)),       # 2-way for v7x megacore
    )(xs, w1x, b1x, w2x, b2x)

    out = out[:, :, :cout].reshape(bsz, ho, wo, cout)
    return jnp.transpose(out, (0, 3, 1, 2))           # back to NCHW


# ---------------------------------------------------------------------------
# Pure-JAX reference (lax conv) for a correctness sanity check.
# ---------------------------------------------------------------------------
def _space_to_channel_nhwc(x, n=2):
    b, h, w, c = x.shape
    x = x.reshape(b, h // n, n, w // n, n, c)
    x = jnp.transpose(x, (0, 1, 3, 5, 2, 4))          # channel = c*4 + i*2 + j
    return x.reshape(b, h // n, w // n, c * n * n)


def _ref_conv_lrelu(x, w, b, scale, slope=0.2):
    y = jax.lax.conv_general_dilated(
        x * scale, w, (1, 1), "SAME",
        dimension_numbers=("NHWC", "HWIO", "NHWC"))
    y = y + b[None, None, None, :]
    return jnp.where(y > 0, y, slope * y)


def _ref_forward(x_nchw, p):
    x = jnp.transpose(x_nchw, (0, 2, 3, 1))
    y = _ref_conv_lrelu(x, p["w1"], p["b1"], p["scale1"])
    y = _space_to_channel_nhwc(y)
    y = _ref_conv_lrelu(y, p["w2"], p["b2"], p["scale2"])
    return jnp.transpose(y, (0, 3, 1, 2))


if __name__ == "__main__":
    B, C_IN, C_OUT, H, W = 2, 4, 8, 16, 16

    key = jax.random.PRNGKey(0)
    kx, kp = jax.random.split(key)
    x = jax.random.normal(kx, (B, C_IN, H, W), jnp.float32)
    params = init_upscale_block_params(kp, C_IN, C_OUT)

    fwd = jax.jit(upscale_block_forward)
    out = jax.block_until_ready(fwd(x, params))
    assert out.shape == (B, C_OUT, H // 2, W // 2), out.shape

    ref = jax.block_until_ready(_ref_forward(x, params))
    max_err = float(jnp.max(jnp.abs(out - ref)))
    assert jnp.allclose(out, ref, atol=1e-3, rtol=1e-3), max_err

    print("KERNEL_OK")
</pallas_src>

<mosaic_0001>
module attributes {stable_mosaic.version = 11 : i64} {
  func.func @_upscale_block_kernel(%arg0: i32, %arg1: memref<1x9x9x16xf32, #tpu.memory_space<vmem>>, %arg2: memref<64x16xf32, #tpu.memory_space<vmem>>, %arg3: memref<1x16xf32, #tpu.memory_space<vmem>>, %arg4: memref<144x128xf32, #tpu.memory_space<vmem>>, %arg5: memref<1x128xf32, #tpu.memory_space<vmem>>, %arg6: memref<1x64x128xf32, #tpu.memory_space<vmem>>, %arg7: memref<10x10x16xf32, #tpu.memory_space<vmem>>) attributes {dimension_semantics = [#tpu.dimension_semantics<parallel>], iteration_bounds = array<i64: 2>, scalar_prefetch = 0 : i64, scratch_operands = 1 : i64, tpu.core_type = #tpu.core_type<tc>, window_params = [{transform_indices = @transform_0, window_bounds = array<i64: 1, 9, 9, 16>}, {pipeline_mode = #tpu.pipeline_mode<synchronous>, transform_indices = @transform_1, window_bounds = array<i64: 64, 16>}, {pipeline_mode = #tpu.pipeline_mode<synchronous>, transform_indices = @transform_2, window_bounds = array<i64: 1, 16>}, {pipeline_mode = #tpu.pipeline_mode<synchronous>, transform_indices = @transform_3, window_bounds = array<i64: 144, 128>}, {pipeline_mode = #tpu.pipeline_mode<synchronous>, transform_indices = @transform_4, window_bounds = array<i64: 1, 128>}, {transform_indices = @transform_5, window_bounds = array<i64: 1, 64, 128>}]} {
    %c0 = arith.constant 0 : index
    %c0_0 = arith.constant 0 : index
    %c0_1 = arith.constant 0 : index
    %c0_2 = arith.constant 0 : index
    %0 = vector.load %arg1[%c0, %c0_0, %c0_1, %c0_2] : memref<1x9x9x16xf32, #tpu.memory_space<vmem>>, vector<1x9x9x16xf32>
    %1 = vector.shape_cast %0 : vector<1x9x9x16xf32> to vector<9x9x16xf32>
    %2 = vector.extract_strided_slice %1 {offsets = [0, 0, 0], sizes = [8, 8, 16], strides = [1, 1, 1]} : vector<9x9x16xf32> to vector<8x8x16xf32>
    %3 = vector.shape_cast %2 : vector<8x8x16xf32> to vector<64x16xf32>
    %4 = vector.extract_strided_slice %1 {offsets = [0, 1, 0], sizes = [8, 8, 16], strides = [1, 1, 1]} : vector<9x9x16xf32> to vector<8x8x16xf32>
    %5 = vector.shape_cast %4 : vector<8x8x16xf32> to vector<64x16xf32>
    %6 = vector.extract_strided_slice %1 {offsets = [1, 0, 0], sizes = [8, 8, 16], strides = [1, 1, 1]} : vector<9x9x16xf32> to vector<8x8x16xf32>
    %7 = vector.shape_cast %6 : vector<8x8x16xf32> to vector<64x16xf32>
    %8 = vector.extract_strided_slice %1 {offsets = [1, 1, 0], sizes = [8, 8, 16], strides = [1, 1, 1]} : vector<9x9x16xf32> to vector<8x8x16xf32>
    %9 = vector.shape_cast %8 : vector<8x8x16xf32> to vector<64x16xf32>
    %10 = tpu.concatenate %3, %5, %7, %9 in 1 : vector<64x16xf32>, vector<64x16xf32>, vector<64x16xf32>, vector<64x16xf32> -> vector<64x64xf32>
    %c0_3 = arith.constant 0 : index
    %c0_4 = arith.constant 0 : index
    %11 = vector.load %arg2[%c0_3, %c0_4] : memref<64x16xf32, #tpu.memory_space<vmem>>, vector<64x16xf32>
    %cst = arith.constant dense<0.000000e+00> : vector<64x16xf32>
    %12 = tpu.matmul %10, %11, %cst {dimension_numbers = #tpu.dot_dimension_numbers<[1], [0], [0], [1], [0, 0, 1, 1], [], []>} : vector<64x64xf32>, vector<64x16xf32>, vector<64x16xf32> -> vector<64x16xf32>
    %c0_5 = arith.constant 0 : index
    %c0_6 = arith.constant 0 : index
    %13 = vector.load %arg3[%c0_5, %c0_6] : memref<1x16xf32, #tpu.memory_space<vmem>>, vector<1x16xf32>
    %14 = vector.broadcast %13 : vector<1x16xf32> to vector<64x16xf32>
    %15 = arith.addf %12, %14 : vector<64x16xf32>
    %cst_7 = arith.constant 2.000000e-01 : f32
    %16 = vector.broadcast %cst_7 : f32 to vector<64x16xf32>
    %17 = arith.mulf %16, %15 : vector<64x16xf32>
    %18 = arith.maximumf %15, %17 : vector<64x16xf32>
    %cst_8 = arith.constant 0.000000e+00 : f32
    %19 = vector.broadcast %cst_8 : f32 to vector<10x10x16xf32>
    %c0_9 = arith.constant 0 : index
    %c0_10 = arith.constant 0 : index
    %c0_11 = arith.constant 0 : index
    %20 = vector.load %arg7[%c0_9, %c0_10, %c0_11] : memref<10x10x16xf32, #tpu.memory_space<vmem>>, vector<10x10x16xf32>
    tpu.vector_store %arg7[%c0_9, %c0_10, %c0_11], %19 {strides = array<i32>} : memref<10x10x16xf32, #tpu.memory_space<vmem>>, vector<10x10x16xf32>,
    %21 = vector.shape_cast %18 : vector<64x16xf32> to vector<8x8x16xf32>
    %c1 = arith.constant 1 : index
    %c1_12 = arith.constant 1 : index
    %c0_13 = arith.constant 0 : index
    %22 = vector.load %arg7[%c1, %c1_12, %c0_13] : memref<10x10x16xf32, #tpu.memory_space<vmem>>, vector<8x8x16xf32>
    tpu.vector_store %arg7[%c1, %c1_12, %c0_13], %21 {strides = array<i32>} : memref<10x10x16xf32, #tpu.memory_space<vmem>>, vector<8x8x16xf32>,
    %c0_14 = arith.constant 0 : index
    %c0_15 = arith.constant 0 : index
    %c0_16 = arith.constant 0 : index
    %23 = vector.load %arg7[%c0_14, %c0_15, %c0_16] : memref<10x10x16xf32, #tpu.memory_space<vmem>>, vector<8x8x16xf32>
    %24 = vector.shape_cast %23 : vector<8x8x16xf32> to vector<64x16xf32>
    %c0_17 = arith.constant 0 : index
    %c1_18 = arith.constant 1 : index
    %c0_19 = arith.constant 0 : index
    %25 = vector.load %arg7[%c0_17, %c1_18, %c0_19] : memref<10x10x16xf32, #tpu.memory_space<vmem>>, vector<8x8x16xf32>
    %26 = vector.shape_cast %25 : vector<8x8x16xf32> to vector<64x16xf32>
    %c0_20 = arith.constant 0 : index
    %c2 = arith.constant 2 : index
    %c0_21 = arith.constant 0 : index
    %27 = vector.load %arg7[%c0_20, %c2, %c0_21] : memref<10x10x16xf32, #tpu.memory_space<vmem>>, vector<8x8x16xf32>
    %28 = vector.shape_cast %27 : vector<8x8x16xf32> to vector<64x16xf32>
    %c1_22 = arith.constant 1 : index
    %c0_23 = arith.constant 0 : index
    %c0_24 = arith.constant 0 : index
    %29 = vector.load %arg7[%c1_22, %c0_23, %c0_24] : memref<10x10x16xf32, #tpu.memory_space<vmem>>, vector<8x8x16xf32>
    %30 = vector.shape_cast %29 : vector<8x8x16xf32> to vector<64x16xf32>
    %c1_25 = arith.constant 1 : index
    %c1_26 = arith.constant 1 : index
    %c0_27 = arith.constant 0 : index
    %31 = vector.load %arg7[%c1_25, %c1_26, %c0_27] : memref<10x10x16xf32, #tpu.memory_space<vmem>>, vector<8x8x16xf32>
    %32 = vector.shape_cast %31 : vector<8x8x16xf32> to vector<64x16xf32>
    %c1_28 = arith.constant 1 : index
    %c2_29 = arith.constant 2 : index
    %c0_30 = arith.constant 0 : index
    %33 = vector.load %arg7[%c1_28, %c2_29, %c0_30] : memref<10x10x16xf32, #tpu.memory_space<vmem>>, vector<8x8x16xf32>
    %34 = vector.shape_cast %33 : vector<8x8x16xf32> to vector<64x16xf32>
    %c2_31 = arith.constant 2 : index
    %c0_32 = arith.constant 0 : index
    %c0_33 = arith.constant 0 : index
    %35 = vector.load %arg7[%c2_31, %c0_32, %c0_33] : memref<10x10x16xf32, #tpu.memory_space<vmem>>, vector<8x8x16xf32>
    %36 = vector.shape_cast %35 : vector<8x8x16xf32> to vector<64x16xf32>
    %c2_34 = arith.constant 2 : index
    %c1_35 = arith.constant 1 : index
    %c0_36 = arith.constant 0 : index
    %37 = vector.load %arg7[%c2_34, %c1_35, %c0_36] : memref<10x10x16xf32, #tpu.memory_space<vmem>>, vector<8x8x16xf32>
    %38 = vector.shape_cast %37 : vector<8x8x16xf32> to vector<64x16xf32>
    %c2_37 = arith.constant 2 : index
    %c2_38 = arith.constant 2 : index
    %c0_39 = arith.constant 0 : index
    %39 = vector.load %arg7[%c2_37, %c2_38, %c0_39] : memref<10x10x16xf32, #tpu.memory_space<vmem>>, vector<8x8x16xf32>
    %40 = vector.shape_cast %39 : vector<8x8x16xf32> to vector<64x16xf32>
    %41 = tpu.concatenate %24, %26, %28, %30, %32, %34, %36, %38, %40 in 1 : vector<64x16xf32>, vector<64x16xf32>, vector<64x16xf32>, vector<64x16xf32>, vector<64x16xf32>, vector<64x16xf32>, vector<64x16xf32>, vector<64x16xf32>, vector<64x16xf32> -> vector<64x144xf32>
    %c0_40 = arith.constant 0 : index
    %c0_41 = arith.constant 0 : index
    %42 = vector.load %arg4[%c0_40, %c0_41] : memref<144x128xf32, #tpu.memory_space<vmem>>, vector<144x128xf32>
    %cst_42 = arith.constant dense<0.000000e+00> : vector<64x128xf32>
    %43 = tpu.matmul %41, %42, %cst_42 {dimension_numbers = #tpu.dot_dimension_numbers<[1], [0], [0], [1], [0, 0, 1, 1], [], []>} : vector<64x144xf32>, vector<144x128xf32>, vector<64x128xf32> -> vector<64x128xf32>
    %c0_43 = arith.constant 0 : index
    %c0_44 = arith.constant 0 : index
    %44 = vector.load %arg5[%c0_43, %c0_44] : memref<1x128xf32, #tpu.memory_space<vmem>>, vector<1x128xf32>
    %45 = vector.broadcast %44 : vector<1x128xf32> to vector<64x128xf32>
    %46 = arith.addf %43, %45 : vector<64x128xf32>
    %cst_45 = arith.constant 2.000000e-01 : f32
    %47 = vector.broadcast %cst_45 : f32 to vector<64x128xf32>
    %48 = arith.mulf %47, %46 : vector<64x128xf32>
    %49 = arith.maximumf %46, %48 : vector<64x128xf32>
    %c0_46 = arith.constant 0 : index
    %c0_47 = arith.constant 0 : index
    %c0_48 = arith.constant 0 : index
    %50 = vector.load %arg6[%c0_46, %c0_47, %c0_48] : memref<1x64x128xf32, #tpu.memory_space<vmem>>, vector<1x64x128xf32>
    %51 = vector.shape_cast %50 : vector<1x64x128xf32> to vector<64x128xf32>
    %52 = vector.shape_cast %49 : vector<64x128xf32> to vector<1x64x128xf32>
    tpu.vector_store %arg6[%c0_46, %c0_47, %c0_48], %52 {strides = array<i32>} : memref<1x64x128xf32, #tpu.memory_space<vmem>>, vector<1x64x128xf32>,
    return
  }
  func.func @transform_0(%arg0: i32) -> (i32, i32, i32, i32) {
    %c0_i32 = arith.constant 0 : i32
    %c0_i32_0 = arith.constant 0 : i32
    %c0_i32_1 = arith.constant 0 : i32
    %c0_i32_2 = arith.constant 0 : i32
    return %arg0, %c0_i32, %c0_i32_0, %c0_i32_1 : i32, i32, i32, i32
  }
  func.func @transform_1(%arg0: i32) -> (i32, i32) {
    %c0_i32 = arith.constant 0 : i32
    %c0_i32_0 = arith.constant 0 : i32
    %c0_i32_1 = arith.constant 0 : i32
    return %c0_i32, %c0_i32_0 : i32, i32
  }
  func.func @transform_2(%arg0: i32) -> (i32, i32) {
    %c0_i32 = arith.constant 0 : i32
    %c0_i32_0 = arith.constant 0 : i32
    %c0_i32_1 = arith.constant 0 : i32
    return %c0_i32, %c0_i32_0 : i32, i32
  }
  func.func @transform_3(%arg0: i32) -> (i32, i32) {
    %c0_i32 = arith.constant 0 : i32
    %c0_i32_0 = arith.constant 0 : i32
    %c0_i32_1 = arith.constant 0 : i32
    return %c0_i32, %c0_i32_0 : i32, i32
  }
  func.func @transform_4(%arg0: i32) -> (i32, i32) {
    %c0_i32 = arith.constant 0 : i32
    %c0_i32_0 = arith.constant 0 : i32
    %c0_i32_1 = arith.constant 0 : i32
    return %c0_i32, %c0_i32_0 : i32, i32
  }
  func.func @transform_5(%arg0: i32) -> (i32, i32, i32) {
    %c0_i32 = arith.constant 0 : i32
    %c0_i32_0 = arith.constant 0 : i32
    %c0_i32_1 = arith.constant 0 : i32
    return %arg0, %c0_i32, %c0_i32_0 : i32, i32, i32
  }
}

</mosaic_0001>

<bundles_post_ra>
// kernel: tile.8
= control target key start
LH: loop header
LB: loop body
LE: loop exit
PB: predicated region body
PF: predicated region fallthrough
CT: control target
= control target key end

     0   :  { %s22_s0 = inlined_call_operand.vmem [shape: f32[4], index: 0, kind: input, shape index: {}]   ;;  %s23_s1 = inlined_call_operand.vmem [shape: f32[4,4], index: 1, kind: output, shape index: {}]  }
   0x1   :  { %v4_v0 = vld [vmem:[%s22_s0] ss:$0 sm:$0xff] }
   0x2   :  { %5 = vst [vmem:[%s23_s1] sm:$0xf] %v4_v0 }

// kernel: tile.9
= control target key start
LH: loop header
LB: loop body
LE: loop exit
PB: predicated region body
PF: predicated region fallthrough
CT: control target
= control target key end

     0   :  { %s37_s8 = smov 4   ;;  %s38_s9 = smov 8   ;;  %vm7_vm0 = vcmask 31744   ;;  %vm13_vm1 = vcmask 130144   ;;  %vm19_vm2 = vcmask 97344   ;;  %vm25_vm3 = vcmask 64544   ;;  %s55_s0 = inlined_call_operand.vmem [shape: f32[4,4], index: 0, kind: input, shape index: {}]   ;;  %s56_s1 = inlined_call_operand.vmem [shape: f32[1,16], index: 1, kind: output, shape index: {}]  }
   0x1   :  { %v4_v0 = vld [vmem:[%s55_s0] sm:$0xf]  ;;  %s36_s0 = smov 12  }
   0x2   :  { %5 = vst [vmem:[#allocation1] sm:$0xf] %v4_v0 }
   0x9   :  { %v10_v1 = vld [vmem:[#allocation1 + $0x3] sm:$0x1]   ;;  %v22_v2 = vld [vmem:[#allocation1 + $0x1] sm:$0x1]   ;;  %v16_v3 = vld [vmem:[#allocation1 + $0x2] sm:$0x1]  }
   0xa   :  { %11 = vrot.lane.b32.xlu0 %v10_v1, %s36_s0  ;;  %23 = vrot.lane.b32.xlu1 %v22_v2, %s37_s8  ;;  %v6_v4 = vld [vmem:[#allocation1] sm:$0x1]  }
   0xb   :  { %8 = vst.msk [vmem:[#allocation0] sm:$0x1] %vm7_vm0, %v6_v4  }
  0x12   :  { %17 = vrot.lane.b32.xlu0 %v16_v3, %s38_s9 }
  0x7c   :  { %v12_v5 = vpop.permute.xlu0 %11   ;;  %v24_v6 = vpop.permute.xlu1 %23  }
  0x7d   :  { %14 = vst.msk [vmem:[#allocation0] sm:$0x1] %vm13_vm1, %v12_v5  }
  0x84   :  { %v18_v7 = vpop.permute.xlu0 %17  }
  0x85   :  { %20 = vst.msk [vmem:[#allocation0] sm:$0x1] %vm19_vm2, %v18_v7  }
  0x86   :  { %26 = vst.msk [vmem:[#allocation0] sm:$0x1] %vm25_vm3, %v24_v6  }
  0x8d   :  { %v29_v8 = vld [vmem:[#allocation0] sm:$0x1] }
  0x8e   :  { %32 = vst [vmem:[%s56_s1] sm:$0x1] %v29_v8 }

// kernel: upscale_block_forward.1
= control target key start
LH: loop header
LB: loop body
LE: loop exit
PB: predicated region body
PF: predicated region fallthrough
CT: control target
= control target key end

     0   :  { %s1313_s18 = smov 0   ;;  %s1724_s0 = inlined_call_operand.vmem [shape: f32[2,9,9,16], index: 0, kind: input, shape index: {}]   ;;  %s1725_s1 = inlined_call_operand.vmem [shape: f32[64,16], index: 1, kind: input, shape index: {}]   ;;  %s1726_s2 = inlined_call_operand.vmem [shape: f32[1,16], index: 2, kind: input, shape index: {}]   ;;  %s1727_s3 = inlined_call_operand.vmem [shape: f32[144,128], index: 3, kind: input, shape index: {}]   ;;  %s1728_s4 = inlined_call_operand.vmem [shape: f32[1,128], index: 4, kind: input, shape index: {}]   ;;  %s1729_s5 = inlined_call_operand.vmem [shape: f32[2,64,128], index: 5, kind: output, shape index: {}]  }
   0x1 LB: > { %s1075_s19 = sadd.s32 4294967295, %s1273_s18   ;;  %p1079_p0 = scmp.ge.s32.totalorder %s1273_s18, 1  ;;  %s1273_s18 = sphi %s1313_s18, %s15_s18  }
   0x2   : > { %p187_p1 = scmp.lt.s32.totalorder %s1273_s18, 3 }
   0x4   : > { %p188_p2 = pnand %p1079_p0, %p187_p1 }
   0x5   : > { %p215_p3 = scmp.lt.s32.totalorder (!%p188_p2), %s1075_s19, 1  ;;  %s1275_s24 = smov (!%p188_p2), 32  }
   0x6   : > { %191 = sbr.rel (%p188_p2) target bundleno = 634 (0x27a), region = 40  ;;  %s1276_s25 = smov (!%p188_p2), 48  }
   0x7   : > { %s1277_s26 = smov (!%p188_p2), 16   ;;  %s1279_s29 = smov (!%p188_p2), 80  }
   0x8   : > { %s1280_s30 = smov (!%p188_p2), 64   ;;  %s1281_s6 = smov (!%p188_p2), 96  }
   0x9   : > { %s1282_s7 = smov (!%p188_p2), 112  }
   0xb   : > { %s1731_s19 = smov (!%p215_p3, %s1075_s19), 1  ;;  %vm259_vm0 = vcmask 1046528   ;;  %v395_v29 = vld [vmem:[%s1725_s1 + $0x38] sm:$0xff]  ;;  %v394_v30 = vld [vmem:[%s1725_s1 + $0x30] sm:$0xff]  ;;  %v393_v31 = vld [vmem:[%s1725_s1 + $0x28] sm:$0xff]  ;;  %vm361_vm1 = vcmask 130048  }
   0xc   : > { %s1118_s20 = smul.u32 144, %s1731_s19  ;;  %433 = vmatpush.msra.mxu0 %v395_v29  ;;  %v392_v48 = vld [vmem:[%s1725_s1 + $0x20] sm:$0xff]  ;;  %v391_v49 = vld [vmem:[%s1725_s1 + $0x18] sm:$0xff]  ;;  %v390_v50 = vld [vmem:[%s1725_s1 + $0x10] sm:$0xff]  ;;  %vm370_vm2 = vcmask 261120   ;;  %vm379_vm3 = vcmask 392192  }
   0xd   : > { %v389_v51 = vld [vmem:[%s1725_s1 + $0x8] sm:$0xff]  ;;  %v388_v52 = vld [vmem:[%s1725_s1] sm:$0xff]  ;;  %vm400_vm4 = vcmask 523264   ;;  %vm483_vm5 = vcmask 123904   ;;  %vm841_vm6 = vcmask 654336   ;;  %vm850_vm7 = vcmask 785408  }
   0xe   : > { %s1327_s23 = scalar_lea.vmem %s1724_s0, %s1118_s20  ;;  %434 = vmatpush.msra.mxu0 %v394_v30  ;;  %vm859_vm8 = vcmask 916480  }
   0xf   : > { %v1330_v0 = vld [vmem:[%s1327_s23 + $0x10] sm:$0xff]  ;;  %v228_v1 = vld [vmem:[%s1327_s23 + $0x18] sm:$0x1]  ;;  %v1334_v2 = vld [vmem:[%s1327_s23] sm:$0xff] }
  0x10   : > { %v263_v3 = vrot.slane %v1330_v0, 1  ;;  %v264_v4 = vrot.slane %v228_v1, 1  ;;  %v226_v5 = vld [vmem:[%s1327_s23 + $0x8] sm:$0x1]  ;;  %v260_v6 = vrot.slane %v1334_v2, 1  ;;  %v1340_v7 = vld [vmem:[%s1327_s23 + $0x20] sm:$0xff]  ;;  %435 = vmatpush.msra.mxu0 %v393_v31 }
  0x11   : > { %v261_v8 = vrot.slane %v226_v5, 1  ;;  %v230_v9 = vld [vmem:[%s1327_s23 + $0x28] sm:$0x1]  ;;  %315 = vrot.lane.b32.xlu2 %v1340_v7, %s1275_s24  ;;  %v266_v12 = vrot.slane %v1340_v7, 1  ;;  %v232_v15 = vld [vmem:[%s1327_s23 + $0x38] sm:$0x1] }
  0x12   : > { %v265_v10 = vsel %vm259_vm0, %v263_v3, %v264_v4  ;;  %v267_v13 = vrot.slane %v230_v9, 1  ;;  %v1355_v16 = vld [vmem:[%s1327_s23 + $0x30] sm:$0xff]  ;;  %v270_v18 = vrot.slane %v232_v15, 1  ;;  %v234_v20 = vld [vmem:[%s1327_s23 + $0x48] sm:$0x1]  ;;  %v1366_v21 = vld [vmem:[%s1327_s23 + $0x40] sm:$0xff]  ;;  %436 = vmatpush.msra.mxu0 %v392_v48 }
  0x13   : > { %337 = vrot.lane.b32.xlu1 %v265_v10, %s1276_s25  ;;  %v262_v11 = vsel %vm259_vm0, %v260_v6, %v261_v8  ;;  %v269_v17 = vrot.slane %v1355_v16, 1  ;;  %v272_v22 = vrot.slane %v1366_v21, 1  ;;  %v273_v23 = vrot.slane %v234_v20, 1  ;;  %v236_v25 = vld [vmem:[%s1327_s23 + $0x58] sm:$0x1]  ;;  %v1376_v26 = vld [vmem:[%s1327_s23 + $0x50] sm:$0xff] }
  0x14   : > { %289 = vrot.lane.b32.xlu0 %v262_v11, %s1277_s26  ;;  %v268_v14 = vsel %vm259_vm0, %v266_v12, %v267_v13  ;;  %v275_v27 = vrot.slane %v1376_v26, 1  ;;  %v276_v28 = vrot.slane %v236_v25, 1  ;;  %v238_v33 = vld [vmem:[%s1327_s23 + $0x68] sm:$0x1]  ;;  %v1395_v34 = vld [vmem:[%s1327_s23 + $0x60] sm:$0xff]  ;;  %v1405_v39 = vld [vmem:[%s1327_s23 + $0x70] sm:$0xff]  ;;  %437 = vmatpush.msra.mxu0 %v391_v49 }
  0x15   : > { %v271_v19 = vsel %vm259_vm0, %v269_v17, %v270_v18  ;;  %v274_v24 = vsel %vm259_vm0, %v272_v22, %v273_v23  ;;  %v278_v35 = vrot.slane %v1395_v34, 1  ;;  %v279_v36 = vrot.slane %v238_v33, 1  ;;  %v240_v38 = vld [vmem:[%s1327_s23 + $0x78] sm:$0x1]  ;;  %v242_v42 = vld [vmem:[%s1327_s23 + $0x88] sm:$0x1] }
  0x16   : > { %v277_v32 = vsel %vm259_vm0, %v275_v27, %v276_v28  ;;  %v281_v40 = vrot.slane %v1405_v39, 1  ;;  %v282_v41 = vrot.slane %v240_v38, 1  ;;  %v241_v44 = vld [vmem:[%s1327_s23 + $0x80] sm:$0xff]  ;;  %v287_v46 = vrot.slane %v242_v42, 1  ;;  %438 = vmatpush.msra.mxu0 %v390_v50  ;;  %v885_v38 = vld [vmem:[%s1727_s3 + $0x88] sm:$0xff] }
  0x17   : > { %v280_v37 = vsel %vm259_vm0, %v278_v35, %v279_v36  ;;  %v286_v45 = vrot.slane %v241_v44, 1  ;;  %969 = vmatpush.msra.mxu2 %v885_v38 }
  0x18   : > { %v283_v43 = vsel %vm259_vm0, %v281_v40, %v282_v41  ;;  %439 = vmatpush.msra.mxu0 %v389_v51  ;;  %v1504_v40 = vld [vmem:[%s1726_s2] ss:$0 sm:$0xff] }
  0x19   : > { %339 = vrot.lane.b32.xlu2 %v268_v14, %s1276_s25  ;;  %v288_v47 = vsel %vm259_vm0, %v286_v45, %v287_v46 }
  0x1a   : > { %440 = vmatpush.msra.mxu0 %v388_v52 }
  0x1b   : > { %291 = vrot.lane.b32.xlu1 %v265_v10, %s1277_s26 }
  0x1c   : > { %313 = vrot.lane.b32.xlu0 %v1330_v0, %s1275_s24 }
  0x21   : > { %341 = vrot.lane.b32.xlu2 %v271_v19, %s1276_s25 }
  0x23   : > { %317 = vrot.lane.b32.xlu1 %v1355_v16, %s1275_s24 }
  0x24   : > { %293 = vrot.lane.b32.xlu0 %v268_v14, %s1277_s26 }
  0x29   : > { %343 = vrot.lane.b32.xlu2 %v274_v24, %s1276_s25 }
  0x2b   : > { %319 = vrot.lane.b32.xlu1 %v1366_v21, %s1275_s24 }
  0x2c   : > { %295 = vrot.lane.b32.xlu0 %v271_v19, %s1277_s26 }
  0x31   : > { %345 = vrot.lane.b32.xlu2 %v277_v32, %s1276_s25 }
  0x33   : > { %321 = vrot.lane.b32.xlu1 %v1376_v26, %s1275_s24 }
  0x34   : > { %297 = vrot.lane.b32.xlu0 %v274_v24, %s1277_s26 }
  0x39   : > { %347 = vrot.lane.b32.xlu2 %v280_v37, %s1276_s25 }
  0x3b   : > { %323 = vrot.lane.b32.xlu1 %v1395_v34, %s1275_s24 }
  0x3c   : > { %299 = vrot.lane.b32.xlu0 %v277_v32, %s1277_s26 }
  0x41   : > { %349 = vrot.lane.b32.xlu2 %v283_v43, %s1276_s25 }
  0x43   : > { %325 = vrot.lane.b32.xlu1 %v1405_v39, %s1275_s24 }
  0x44   : > { %301 = vrot.lane.b32.xlu0 %v280_v37, %s1277_s26 }
  0x49   : > { %351 = vrot.lane.b32.xlu2 %v288_v47, %s1276_s25 }
  0x4b   : > { %327 = vrot.lane.b32.xlu1 %v241_v44, %s1275_s24 }
  0x4c   : > { %303 = vrot.lane.b32.xlu0 %v283_v43, %s1277_s26 }
  0x6b   : > { %v316_v53 = vpop.permute.xlu2 %315 }
  0x73   : > { %v340_v56 = vpop.permute.xlu2 %339 }
  0x7b   : > { %v342_v62 = vpop.permute.xlu2 %341 }
  0x83   : > { %v344_v8 = vpop.permute.xlu2 %343 }
  0x85   : > { %v338_v54 = vpop.permute.xlu1 %337 }
  0x86   : > { %v290_v55 = vpop.permute.xlu0 %289 }
  0x87   : > { %v362_v58 = vsel %vm361_vm1, %v1334_v2, %v290_v55 }
  0x8b   : > { %v346_v14 = vpop.permute.xlu2 %345 }
  0x8d   : > { %v292_v57 = vpop.permute.xlu1 %291 }
  0x8e   : > { %v314_v59 = vpop.permute.xlu0 %313  ;;  %v363_v63 = vsel %vm361_vm1, %v1330_v0, %v292_v57 }
  0x8f   : > { %v371_v60 = vsel %vm370_vm2, %v362_v58, %v314_v59  ;;  %v372_v1 = vsel %vm370_vm2, %v363_v63, %v316_v53 }
  0x90   : > { %v380_v61 = vsel %vm379_vm3, %v371_v60, %v338_v54  ;;  %v381_v5 = vsel %vm379_vm3, %v372_v1, %v340_v56 }
  0x91   : > { %1083 = vmatmul.msk.f32.vlgmr.msra.gmra.mxu0 %vm400_vm4, %v380_v61 }
  0x93   : > { %v348_v22 = vpop.permute.xlu2 %347 }
  0x95   : > { %v318_v3 = vpop.permute.xlu1 %317 }
  0x96   : > { %v294_v4 = vpop.permute.xlu0 %293 }
  0x97   : > { %v364_v2 = vsel %vm361_vm1, %v1340_v7, %v294_v4 }
  0x98   : > { %v373_v6 = vsel %vm370_vm2, %v364_v2, %v318_v3 }
  0x99   : > { %1084 = vmatmul.msk.f32.gmra.mxu0 %vm400_vm4, %v381_v5  ;;  %v382_v10 = vsel %vm379_vm3, %v373_v6, %v342_v62 }
  0x9b   : > { %v350_v29 = vpop.permute.xlu2 %349 }
  0x9d   : > { %v320_v9 = vpop.permute.xlu1 %319 }
  0x9e   : > { %v296_v11 = vpop.permute.xlu0 %295 }
  0x9f   : > { %v365_v0 = vsel %vm361_vm1, %v1355_v16, %v296_v11 }
  0xa0   : > { %v374_v12 = vsel %vm370_vm2, %v365_v0, %v320_v9 }
  0xa1   : > { %1085 = vmatmul.msk.f32.gmra.mxu0 %vm400_vm4, %v382_v10  ;;  %v383_v7 = vsel %vm379_vm3, %v374_v12, %v344_v8 }
  0xa3   : > { %v352_v36 = vpop.permute.xlu2 %351 }
  0xa5   : > { %v322_v13 = vpop.permute.xlu1 %321 }
  0xa6   : > { %v298_v15 = vpop.permute.xlu0 %297 }
  0xa7   : > { %v366_v17 = vsel %vm361_vm1, %v1366_v21, %v298_v15 }
  0xa8   : > { %v375_v18 = vsel %vm370_vm2, %v366_v17, %v322_v13 }
  0xa9   : > { %1086 = vmatmul.msk.f32.gmra.mxu0 %vm400_vm4, %v383_v7  ;;  %v384_v20 = vsel %vm379_vm3, %v375_v18, %v346_v14 }
  0xad   : > { %v324_v19 = vpop.permute.xlu1 %323 }
  0xae   : > { %v300_v16 = vpop.permute.xlu0 %299 }
  0xaf   : > { %v367_v23 = vsel %vm361_vm1, %v1376_v26, %v300_v16 }
  0xb0   : > { %v376_v24 = vsel %vm370_vm2, %v367_v23, %v324_v19 }
  0xb1   : > { %1087 = vmatmul.msk.f32.gmra.mxu0 %vm400_vm4, %v384_v20  ;;  %v385_v25 = vsel %vm379_vm3, %v376_v24, %v348_v22 }
  0xb5   : > { %v326_v21 = vpop.permute.xlu1 %325 }
  0xb6   : > { %v302_v27 = vpop.permute.xlu0 %301 }
  0xb7   : > { %v368_v28 = vsel %vm361_vm1, %v1395_v34, %v302_v27  ;;  %v1278_v34 = vmov 0.0  }
  0xb8   : > { %v377_v30 = vsel %vm370_vm2, %v368_v28, %v326_v21  ;;  %485 = vst.msk [vmem:[#allocation2 + $0x10] sm:$0xff] %vm361_vm1, %v1278_v34 }
  0xb9   : > { %1088 = vmatmul.msk.f32.gmra.mxu0 %vm400_vm4, %v385_v25  ;;  %v386_v31 = vsel %vm379_vm3, %v377_v30, %v350_v29  ;;  %486 = vst.msk [vmem:[#allocation2 + $0x18] sm:$0x3] %vm483_vm5, %v1278_v34 }
  0xba   : > { %482 = vst.msk [vmem:[#allocation2] sm:$0xff] %vm361_vm1, %v1278_v34 }
  0xbb   : > { %484 = vst.msk [vmem:[#allocation2 + $0x8] sm:$0x3] %vm483_vm5, %v1278_v34 }
  0xbc   : > { %487 = vst.msk [vmem:[#allocation2 + $0x20] sm:$0xff] %vm361_vm1, %v1278_v34 }
  0xbd   : > { %v328_v33 = vpop.permute.xlu1 %327  ;;  %488 = vst.msk [vmem:[#allocation2 + $0x28] sm:$0x3] %vm483_vm5, %v1278_v34 }
  0xbe   : > { %v304_v32 = vpop.permute.xlu0 %303  ;;  %489 = vst.msk [vmem:[#allocation2 + $0x30] sm:$0xff] %vm361_vm1, %v1278_v34 }
  0xbf   : > { %v369_v26 = vsel %vm361_vm1, %v1405_v39, %v304_v32  ;;  %490 = vst.msk [vmem:[#allocation2 + $0x38] sm:$0x3] %vm483_vm5, %v1278_v34  ;;  %v884_v39 = vld [vmem:[%s1727_s3 + $0x80] sm:$0xff] }
  0xc0   : > { %v378_v35 = vsel %vm370_vm2, %v369_v26, %v328_v33  ;;  %491 = vst.msk [vmem:[#allocation2 + $0x40] sm:$0xff] %vm361_vm1, %v1278_v34  ;;  %970 = vmatpush.msra.mxu2 %v884_v39 }
  0xc1   : > { %1089 = vmatmul.msk.f32.gmra.mxu0 %vm400_vm4, %v386_v31  ;;  %v387_v37 = vsel %vm379_vm3, %v378_v35, %v352_v36  ;;  %492 = vst.msk [vmem:[#allocation2 + $0x48] sm:$0x3] %vm483_vm5, %v1278_v34 }
  0xc2   : > { %493 = vst.msk [vmem:[#allocation2 + $0x50] sm:$0xff] %vm361_vm1, %v1278_v34  ;;  %v528_v48 = vld [vmem:[#allocation2 + $0x2] sm:$0xff] }
  0xc3   : > { %494 = vst.msk [vmem:[#allocation2 + $0x58] sm:$0x3] %vm483_vm5, %v1278_v34  ;;  %v520_v49 = vld [vmem:[#allocation2 + $0x1] sm:$0xff] }
  0xc4   : > { %495 = vst.msk [vmem:[#allocation2 + $0x60] sm:$0xff] %vm361_vm1, %v1278_v34 }
  0xc5   : > { %496 = vst.msk [vmem:[#allocation2 + $0x68] sm:$0x3] %vm483_vm5, %v1278_v34 }
  0xc6   : > { %497 = vst.msk [vmem:[#allocation2 + $0x70] sm:$0xff] %vm361_vm1, %v1278_v34 }
  0xc7   : > { %498 = vst.msk [vmem:[#allocation2 + $0x78] sm:$0x3] %vm483_vm5, %v1278_v34 }
  0xc8   : > { %499 = vst.msk [vmem:[#allocation2 + $0x80] sm:$0xff] %vm361_vm1, %v1278_v34 }
  0xc9   : > { %1090 = vmatmul.msk.f32.gmra.mxu0 %vm400_vm4, %v387_v37  ;;  %500 = vst.msk [vmem:[#allocation2 + $0x88] sm:$0x3] %vm483_vm5, %v1278_v34 }
  0xca   : > { %501 = vst.msk [vmem:[#allocation2 + $0x90] sm:$0xff] %vm361_vm1, %v1278_v34 }
  0xcb   : > { %502 = vst.msk [vmem:[#allocation2 + $0x98] sm:$0x3] %vm483_vm5, %v1278_v34 }
 0x10e   : > { %v442_v41 = vpop.f32.mrf.mxu0 }
 0x10f   : > { %v443_v42 = vadd.f32 %v1504_v40, %v442_v41 }
 0x111   : > { %v466_v43 = vmul.f32 0.2, %v443_v42 }
 0x113   : > { %v474_v44 = vmax.f32 %v443_v42, %v466_v43 }
 0x115   : > { %504 = vst.msk [vmem:[#allocation2 + $0x11] sm:$0xff] %vm361_vm1, %v474_v44 }
 0x116   : > { %v445_v45 = vpop.f32.mrf.mxu0 }
 0x117   : > { %v446_v46 = vadd.f32 %v1504_v40, %v445_v45 }
 0x119   : > { %v467_v47 = vmul.f32 0.2, %v446_v46 }
 0x11b   : > { %v475_v50 = vmax.f32 %v446_v46, %v467_v47 }
 0x11c   : > { %v529_v51 = vld [vmem:[#allocation2 + $0x12] sm:$0xff] }
 0x11d   : > { %v521_v52 = vld [vmem:[#allocation2 + $0x11] sm:$0xff]  ;;  %505 = vst.msk [vmem:[#allocation2 + $0x21] sm:$0xff] %vm361_vm1, %v475_v50  ;;  %v1140_v53 = vpack.i.bf16 %v529_v51, %v528_v48 }
 0x11e   : > { %v1135_v54 = vpack.i.bf16 %v521_v52, %v520_v49  ;;  %v448_v55 = vpop.f32.mrf.mxu0  ;;  %v1513_v59 = vld [vmem:[#allocation2 + $0x10] sm:$0xff]  ;;  %v883_v50 = vld [vmem:[%s1727_s3 + $0x78] sm:$0xff] }
 0x11f   : > { %v449_v56 = vadd.f32 %v1504_v40, %v448_v55  ;;  %1141 = vrot.lane.b32.xlu1 %v1140_v53, %s1275_s24  ;;  %914 = vmatpush.msra.mxu1 %v883_v50  ;;  %v880_v55 = vld [vmem:[%s1727_s3 + $0x60] sm:$0xff] }
 0x120   : > { %1136 = vrot.lane.b32.xlu0 %v1135_v54, %s1277_s26  ;;  %1102 = vmatpush.msra.mxu3 %v883_v50  ;;  %v881_v54 = vld [vmem:[%s1727_s3 + $0x68] sm:$0xff] }
 0x121   : > { %v468_v57 = vmul.f32 0.2, %v449_v56 }
 0x123   : > { %v476_v58 = vmax.f32 %v449_v56, %v468_v57  ;;  %v568_v56 = vld [vmem:[#allocation2 + $0x90] sm:$0xff] }
 0x124   : > { %v577_v60 = vld [vmem:[#allocation2 + $0x22] sm:$0xff] }
 0x125   : > { %v1515_v61 = vld [vmem:[#allocation2 + $0x20] sm:$0xff]  ;;  %506 = vst.msk [vmem:[#allocation2 + $0x31] sm:$0xff] %vm361_vm1, %v476_v58  ;;  %1091 = vmatmul.msk.f32.vlgmr.msra.gmra.mxu2 %vm361_vm1, %v577_v60  ;;  %v1155_v1 = vpack.i.bf16 %v577_v60, %v529_v51  ;;  %v882_v51 = vld [vmem:[%s1727_s3 + $0x70] sm:$0xff]  ;;  %v879_v58 = vld [vmem:[%s1727_s3 + $0x58] sm:$0xff] }
 0x126   : > { %v545_v62 = vld [vmem:[#allocation2 + $0x21] sm:$0xff]  ;;  %v1145_v63 = vpack.i.bf16 %v1515_v61, %v1513_v59  ;;  %v451_v4 = vpop.f32.mrf.mxu0  ;;  %915 = vmatpush.msra.mxu1 %v882_v51  ;;  %1103 = vmatpush.msra.mxu3 %v882_v51 }
 0x127   : > { %v1150_v3 = vpack.i.bf16 %v545_v62, %v521_v52  ;;  %v452_v5 = vadd.f32 %v1504_v40, %v451_v4  ;;  %1156 = vrot.lane.b32.xlu1 %v1155_v1, %s1279_s29  ;;  %v576_v1 = vld [vmem:[#allocation2 + $0x91] sm:$0xff] }
 0x128   : > { %1146 = vrot.lane.b32.xlu2 %v1145_v63, %s1276_s25  ;;  %916 = vmatpush.msra.mxu1 %v881_v54  ;;  %v876_v63 = vld [vmem:[%s1727_s3 + $0x40] sm:$0xff]  ;;  %v874_v4 = vld [vmem:[%s1727_s3 + $0x30] sm:$0xff] }
 0x129   : > { %1151 = vrot.lane.b32.xlu0 %v1150_v3, %s1280_s30  ;;  %v469_v2 = vmul.f32 0.2, %v452_v5  ;;  %1104 = vmatpush.msra.mxu3 %v881_v54  ;;  %v875_v3 = vld [vmem:[%s1727_s3 + $0x38] sm:$0xff] }
 0x12a   : > { %917 = vmatpush.msra.mxu1 %v880_v55 }
 0x12b   : > { %v477_v6 = vmax.f32 %v452_v5, %v469_v2  ;;  %1105 = vmatpush.msra.mxu3 %v880_v55  ;;  %v873_v5 = vld [vmem:[%s1727_s3 + $0x28] sm:$0xff]  ;;  %v872_v2 = vld [vmem:[%s1727_s3 + $0x20] sm:$0xff] }
 0x12c   : > { %v578_v8 = vld [vmem:[#allocation2 + $0x32] sm:$0xff]  ;;  %918 = vmatpush.msra.mxu1 %v879_v58 }
 0x12d   : > { %v570_v9 = vld [vmem:[#allocation2 + $0x31] sm:$0xff]  ;;  %507 = vst.msk [vmem:[#allocation2 + $0x41] sm:$0xff] %vm361_vm1, %v477_v6  ;;  %1092 = vmatmul.msk.f32.gmra.mxu2 %vm361_vm1, %v578_v8  ;;  %1106 = vmatpush.msra.mxu3 %v879_v58 }
 0x12e   : > { %v1525_v10 = vld [vmem:[#allocation2 + $0x30] sm:$0xff]  ;;  %v1165_v11 = vpack.i.bf16 %v570_v9, %v545_v62  ;;  %v454_v12 = vpop.f32.mrf.mxu0  ;;  %v871_v6 = vld [vmem:[%s1727_s3 + $0x18] sm:$0xff] }
 0x12f   : > { %v1160_v0 = vpack.i.bf16 %v1525_v10, %v1515_v61  ;;  %v455_v13 = vadd.f32 %v1504_v40, %v454_v12 }
 0x131   : > { %1161 = vrot.lane.b32.xlu2 %v1160_v0, %s1281_s6  ;;  %1166 = vrot.lane.b32.xlu0 %v1165_v11, %s1282_s7  ;;  %v470_v14 = vmul.f32 0.2, %v455_v13  ;;  %v868_v11 = vld [vmem:[%s1727_s3] sm:$0xff] }
 0x133   : > { %v478_v7 = vmax.f32 %v455_v13, %v470_v14 }
 0x134   : > { %v579_v15 = vld [vmem:[#allocation2 + $0x42] sm:$0xff] }
 0x135   : > { %508 = vst.msk [vmem:[#allocation2 + $0x51] sm:$0xff] %vm361_vm1, %v478_v7  ;;  %1093 = vmatmul.msk.f32.gmra.mxu2 %vm361_vm1, %v579_v15  ;;  %v571_v39 = vld [vmem:[#allocation2 + $0x41] sm:$0xff] }
 0x136   : > { %v457_v17 = vpop.f32.mrf.mxu0  ;;  %v1566_v43 = vld [vmem:[#allocation2 + $0x40] sm:$0xff] }
 0x137   : > { %v458_v18 = vadd.f32 %v1504_v40, %v457_v17  ;;  %v512_v7 = vld [vmem:[#allocation2] sm:$0xff] }
 0x139   : > { %v471_v19 = vmul.f32 0.2, %v458_v18 }
 0x13b   : > { %v479_v20 = vmax.f32 %v458_v18, %v471_v19 }
 0x13c   : > { %v1537_v16 = vld [vmem:[#allocation2 + $0x52] sm:$0xff] }
 0x13d   : > { %v525_v22 = vld [vmem:[#allocation2 + $0x51] sm:$0xff]  ;;  %509 = vst.msk [vmem:[#allocation2 + $0x61] sm:$0xff] %vm361_vm1, %v479_v20  ;;  %1094 = vmatmul.msk.f32.gmra.mxu2 %vm361_vm1, %v1537_v16  ;;  %v1175_v23 = vpack.i.bf16 %v577_v60, %v1537_v16 }
 0x13e   : > { %v1170_v24 = vpack.i.bf16 %v545_v62, %v525_v22  ;;  %v460_v25 = vpop.f32.mrf.mxu0  ;;  %v1583_v52 = vld [vmem:[#allocation2 + $0x50] sm:$0xff]  ;;  %v877_v62 = vld [vmem:[%s1727_s3 + $0x48] sm:$0xff] }
 0x13f   : > { %v461_v27 = vadd.f32 %v1504_v40, %v460_v25  ;;  %1176 = vrot.lane.b32.xlu2 %v1175_v23, %s1275_s24  ;;  %v878_v60 = vld [vmem:[%s1727_s3 + $0x50] sm:$0xff] }
 0x140   : > { %1171 = vrot.lane.b32.xlu1 %v1170_v24, %s1277_s26  ;;  %919 = vmatpush.msra.mxu1 %v878_v60 }
 0x141   : > { %v472_v21 = vmul.f32 0.2, %v461_v27  ;;  %1107 = vmatpush.msra.mxu3 %v878_v60 }
 0x142   : > { %920 = vmatpush.msra.mxu1 %v877_v62 }
 0x143   : > { %v480_v28 = vmax.f32 %v461_v27, %v472_v21  ;;  %1108 = vmatpush.msra.mxu3 %v877_v62 }
 0x144   : > { %v581_v29 = vld [vmem:[#allocation2 + $0x62] sm:$0xff]  ;;  %921 = vmatpush.msra.mxu1 %v876_v63 }
 0x145   : > { %v1546_v30 = vld [vmem:[#allocation2 + $0x61] sm:$0xff]  ;;  %510 = vst.msk [vmem:[#allocation2 + $0x71] sm:$0xff] %vm361_vm1, %v480_v28  ;;  %1095 = vmatmul.msk.f32.gmra.mxu2 %vm361_vm1, %v581_v29  ;;  %v1190_v32 = vpack.i.bf16 %v578_v8, %v581_v29  ;;  %1109 = vmatpush.msra.mxu3 %v876_v63  ;;  %v870_v8 = vld [vmem:[%s1727_s3 + $0x10] sm:$0xff] }
 0x146   : > { %v1548_v31 = vld [vmem:[#allocation2 + $0x60] sm:$0xff]  ;;  %v1185_v26 = vpack.i.bf16 %v570_v9, %v1546_v30  ;;  %v463_v35 = vpop.f32.mrf.mxu0  ;;  %922 = vmatpush.msra.mxu1 %v875_v3  ;;  %v869_v9 = vld [vmem:[%s1727_s3 + $0x8] sm:$0xff] }
 0x147   : > { %v1180_v33 = vpack.i.bf16 %v1525_v10, %v1548_v31  ;;  %v464_v36 = vadd.f32 %v1504_v40, %v463_v35  ;;  %1191 = vrot.lane.b32.xlu2 %v1190_v32, %s1279_s29  ;;  %1110 = vmatpush.msra.mxu3 %v875_v3 }
 0x148   : > { %1186 = vrot.lane.b32.xlu1 %v1185_v26, %s1280_s30  ;;  %923 = vmatpush.msra.mxu1 %v874_v4 }
 0x149   : > { %1181 = vrot.lane.b32.xlu0 %v1180_v33, %s1276_s25  ;;  %v473_v37 = vmul.f32 0.2, %v464_v36  ;;  %1111 = vmatpush.msra.mxu3 %v874_v4 }
 0x14a   : > { %924 = vmatpush.msra.mxu1 %v873_v5 }
 0x14b   : > { %v481_v34 = vmax.f32 %v464_v36, %v473_v37  ;;  %1112 = vmatpush.msra.mxu3 %v873_v5 }
 0x14c   : > { %v582_v38 = vld [vmem:[#allocation2 + $0x72] sm:$0xff]  ;;  %925 = vmatpush.msra.mxu1 %v872_v2 }
 0x14d   : > { %v574_v41 = vld [vmem:[#allocation2 + $0x71] sm:$0xff]  ;;  %511 = vst.msk [vmem:[#allocation2 + $0x81] sm:$0xff] %vm361_vm1, %v481_v34  ;;  %1096 = vmatmul.msk.f32.gmra.mxu2 %vm361_vm1, %v582_v38  ;;  %v1225_v47 = vpack.i.bf16 %v579_v15, %v582_v38  ;;  %1113 = vmatpush.msra.mxu3 %v872_v2 }
 0x14e   : > { %v1210_v42 = vpack.i.bf16 %v571_v39, %v574_v41  ;;  %v1564_v40 = vld [vmem:[#allocation2 + $0x70] sm:$0xff]  ;;  %926 = vmatpush.msra.mxu1 %v871_v6 }
 0x14f   : > { %1196 = vrot.lane.b32.xlu2 %v1185_v26, %s1277_s26  ;;  %v1205_v45 = vpack.i.bf16 %v1566_v43, %v1564_v40  ;;  %1114 = vmatpush.msra.mxu3 %v871_v6 }
 0x150   : > { %1211 = vrot.lane.b32.xlu1 %v1210_v42, %s1282_s7  ;;  %927 = vmatpush.msra.mxu1 %v870_v8 }
 0x151   : > { %1201 = vrot.lane.b32.xlu0 %v1190_v32, %s1275_s24  ;;  %1115 = vmatpush.msra.mxu3 %v870_v8 }
 0x152   : > { %928 = vmatpush.msra.mxu1 %v869_v9 }
 0x153   : > { %1116 = vmatpush.msra.mxu3 %v869_v9 }
 0x154   : > { %v583_v44 = vld [vmem:[#allocation2 + $0x82] sm:$0xff]  ;;  %929 = vmatpush.msra.mxu1 %v868_v11 }
 0x155   : > { %1097 = vmatmul.msk.f32.gmra.mxu2 %vm361_vm1, %v583_v44  ;;  %v575_v46 = vld [vmem:[#allocation2 + $0x81] sm:$0xff]  ;;  %v1260_v57 = vpack.i.bf16 %v1537_v16, %v583_v44  ;;  %1117 = vmatpush.msra.mxu3 %v868_v11 }
 0x156   : > { %v1245_v48 = vpack.i.bf16 %v525_v22, %v575_v46  ;;  %v567_v49 = vld [vmem:[#allocation2 + $0x80] sm:$0xff] }
 0x157   : > { %1221 = vrot.lane.b32.xlu2 %v1210_v42, %s1280_s30  ;;  %v1240_v53 = vpack.i.bf16 %v1583_v52, %v567_v49 }
 0x158   : > { %1216 = vrot.lane.b32.xlu1 %v1205_v45, %s1276_s25 }
 0x159   : > { %1206 = vrot.lane.b32.xlu0 %v1205_v45, %s1281_s6 }
 0x15f   : > { %1246 = vrot.lane.b32.xlu2 %v1245_v48, %s1282_s7 }
 0x160   : > { %1236 = vrot.lane.b32.xlu1 %v1225_v47, %s1275_s24 }
 0x161   : > { %1226 = vrot.lane.b32.xlu0 %v1225_v47, %s1279_s29 }
 0x167   : > { %1251 = vrot.lane.b32.xlu2 %v1240_v53, %s1276_s25 }
 0x168   : > { %1241 = vrot.lane.b32.xlu1 %v1240_v53, %s1281_s6 }
 0x169   : > { %1231 = vrot.lane.b32.xlu0 %v1210_v42, %s1277_s26  ;;  %s1101_s26 = sshll.u32 %s1731_s19, 6 }
 0x16a   : > { %s1711_s21 = scalar_lea.vmem %s1729_s5, %s1101_s26 }
 0x16f   : > { %767 = vrot.lane.b32.xlu2 %v568_v56, %s1281_s6 }
 0x170   : > { %1261 = vrot.lane.b32.xlu1 %v1260_v57, %s1279_s29 }
 0x171   : > { %1256 = vrot.lane.b32.xlu0 %v1245_v48, %s1280_s30 }
 0x177   : > { %793 = vrot.lane.b32.xlu2 %v1546_v30, %s1282_s7 }
 0x178   : > { %761 = vrot.lane.b32.xlu1 %v1548_v31, %s1281_s6 }
 0x179   : > { %799 = vrot.lane.b32.xlu0 %v576_v1, %s1282_s7 }
 0x182   : > { %v1147_v13 = vpop.permute.xlu2 %1146 }
 0x183   : > { %v1148_v16 = vunpack.i.l.bf16 %v1147_v13  ;;  %v1149_v36 = vunpack.i.h.bf16 %v1147_v13 }
 0x18b   : > { %v1162_v24 = vpop.permute.xlu2 %1161 }
 0x18c   : > { %v1163_v32 = vunpack.i.l.bf16 %v1162_v24  ;;  %v1164_v46 = vunpack.i.h.bf16 %v1162_v24 }
 0x191   : > { %v1142_v0 = vpop.permute.xlu1 %1141 }
 0x192   : > { %v1137_v12 = vpop.permute.xlu0 %1136  ;;  %v1143_v15 = vunpack.i.l.bf16 %v1142_v0  ;;  %v1144_v21 = vunpack.i.h.bf16 %v1142_v0 }
 0x193   : > { %v1138_v14 = vunpack.i.l.bf16 %v1137_v12  ;;  %v1139_v22 = vunpack.i.h.bf16 %v1137_v12 }
 0x195   : > { %v809_v17 = vsel %vm361_vm1, %v512_v7, %v1138_v14  ;;  %v810_v29 = vsel %vm361_vm1, %v1513_v59, %v1139_v22 }
 0x196   : > { %v817_v18 = vsel %vm370_vm2, %v809_v17, %v1143_v15  ;;  %v818_v26 = vsel %vm370_vm2, %v810_v29, %v1144_v21 }
 0x197   : > { %v825_v27 = vsel %vm379_vm3, %v817_v18, %v1148_v16  ;;  %v826_v41 = vsel %vm379_vm3, %v818_v26, %v1149_v36 }
 0x199   : > { %v1157_v19 = vpop.permute.xlu1 %1156  ;;  %v1177_v34 = vpop.permute.xlu2 %1176 }
 0x19a   : > { %v1158_v25 = vunpack.i.l.bf16 %v1157_v19  ;;  %v1159_v39 = vunpack.i.h.bf16 %v1157_v19  ;;  %v1179_v4 = vunpack.i.h.bf16 %v1177_v34  ;;  %v1178_v5 = vunpack.i.l.bf16 %v1177_v34 }
 0x19b   : > { %v1152_v20 = vpop.permute.xlu0 %1151 }
 0x19c   : > { %v1153_v23 = vunpack.i.l.bf16 %v1152_v20  ;;  %v1154_v33 = vunpack.i.h.bf16 %v1152_v20 }
 0x19e   : > { %v833_v28 = vsel %vm400_vm4, %v825_v27, %v1153_v23  ;;  %v834_v59 = vsel %vm400_vm4, %v826_v41, %v1154_v33  ;;  %v584_v23 = vld [vmem:[#allocation2 + $0x92] sm:$0xff] }
 0x19f   : > { %v842_v30 = vsel %vm841_vm6, %v833_v28, %v1158_v25  ;;  %v843_v45 = vsel %vm841_vm6, %v834_v59, %v1159_v39  ;;  %1098 = vmatmul.msk.f32.gmra.mxu2 %vm361_vm1, %v584_v23 }
 0x1a0   : > { %v851_v38 = vsel %vm850_vm7, %v842_v30, %v1163_v32  ;;  %v852_v47 = vsel %vm850_vm7, %v843_v45, %v1164_v46 }
 0x1a1   : > { %v1192_v49 = vpop.permute.xlu2 %1191 }
 0x1a2   : > { %v1194_v13 = vunpack.i.h.bf16 %v1192_v49  ;;  %v1193_v14 = vunpack.i.l.bf16 %v1192_v49 }
 0x1a3   : > { %v1167_v35 = vpop.permute.xlu0 %1166 }
 0x1a4   : > { %v1168_v37 = vunpack.i.l.bf16 %v1167_v35  ;;  %v1169_v44 = vunpack.i.h.bf16 %v1167_v35 }
 0x1a6   : > { %v860_v42 = vsel %vm859_vm8, %v851_v38, %v1168_v37  ;;  %v861_v48 = vsel %vm859_vm8, %v852_v47, %v1169_v44 }
 0x1a7   : > { %930 = vmatmul.f32.vlgmr.msra.gmra.mxu1 %v860_v42 }
 0x1a9   : > { %v1197_v51 = vpop.permute.xlu2 %1196 }
 0x1aa   : > { %v1199_v28 = vunpack.i.h.bf16 %v1197_v51  ;;  %v1198_v29 = vunpack.i.l.bf16 %v1197_v51 }
 0x1ac   : > { %v812_v37 = vsel %vm361_vm1, %v1525_v10, %v1199_v28  ;;  %v815_v34 = vsel %vm361_vm1, %v1548_v31, %v1198_v29  ;;  %v972_v28 = vpop.f32.mrf.mxu2 }
 0x1af   : > { %933 = vmatmul.f32.gmra.mxu1 %v861_v48 }
 0x1b1   : > { %v1222_v62 = vpop.permute.xlu2 %1221 }
 0x1b2   : > { %v1172_v50 = vpop.permute.xlu1 %1171  ;;  %v1224_v46 = vunpack.i.h.bf16 %v1222_v62  ;;  %v1223_v47 = vunpack.i.l.bf16 %v1222_v62 }
 0x1b3   : > { %v1174_v55 = vunpack.i.h.bf16 %v1172_v50  ;;  %v1173_v56 = vunpack.i.l.bf16 %v1172_v50 }
 0x1b5   : > { %v811_v58 = vsel %vm361_vm1, %v1515_v61, %v1174_v55  ;;  %v814_v60 = vsel %vm361_vm1, %v1583_v52, %v1173_v56 }
 0x1b6   : > { %v819_v8 = vsel %vm370_vm2, %v811_v58, %v1179_v4  ;;  %v822_v9 = vsel %vm370_vm2, %v814_v60, %v1178_v5 }
 0x1b9   : > { %v1247_v18 = vpop.permute.xlu2 %1246 }
 0x1ba   : > { %v1187_v53 = vpop.permute.xlu1 %1186  ;;  %v1249_v48 = vunpack.i.h.bf16 %v1247_v18  ;;  %v1248_v49 = vunpack.i.l.bf16 %v1247_v18 }
 0x1bb   : > { %v1182_v54 = vpop.permute.xlu0 %1181  ;;  %v1189_v2 = vunpack.i.h.bf16 %v1187_v53  ;;  %v1188_v6 = vunpack.i.l.bf16 %v1187_v53 }
 0x1bc   : > { %v1184_v63 = vunpack.i.h.bf16 %v1182_v54  ;;  %v1183_v1 = vunpack.i.l.bf16 %v1182_v54 }
 0x1be   : > { %v827_v11 = vsel %vm379_vm3, %v819_v8, %v1184_v63  ;;  %v830_v0 = vsel %vm379_vm3, %v822_v9, %v1183_v1 }
 0x1bf   : > { %v835_v12 = vsel %vm400_vm4, %v827_v11, %v1189_v2  ;;  %v838_v52 = vsel %vm400_vm4, %v830_v0, %v1188_v6 }
 0x1c0   : > { %v844_v16 = vsel %vm841_vm6, %v835_v12, %v1194_v13  ;;  %v847_v22 = vsel %vm841_vm6, %v838_v52, %v1193_v14 }
 0x1c1   : > { %v1252_v38 = vpop.permute.xlu2 %1251 }
 0x1c2   : > { %v1212_v57 = vpop.permute.xlu1 %1211  ;;  %v1253_v11 = vunpack.i.l.bf16 %v1252_v38  ;;  %v1254_v12 = vunpack.i.h.bf16 %v1252_v38 }
 0x1c3   : > { %v1202_v3 = vpop.permute.xlu0 %1201  ;;  %v1214_v19 = vunpack.i.h.bf16 %v1212_v57  ;;  %v1213_v20 = vunpack.i.l.bf16 %v1212_v57 }
 0x1c4   : > { %v1204_v32 = vunpack.i.h.bf16 %v1202_v3  ;;  %v1203_v26 = vunpack.i.l.bf16 %v1202_v3 }
 0x1c6   : > { %v820_v39 = vsel %vm370_vm2, %v812_v37, %v1204_v32  ;;  %v823_v41 = vsel %vm370_vm2, %v815_v34, %v1203_v26  ;;  %v975_v37 = vpop.f32.mrf.mxu2 }
 0x1c9   : > { %v768_v2 = vpop.permute.xlu2 %767 }
 0x1ca   : > { %v1217_v61 = vpop.permute.xlu1 %1216 }
 0x1cb   : > { %v1207_v7 = vpop.permute.xlu0 %1206  ;;  %v1219_v35 = vunpack.i.h.bf16 %v1217_v61  ;;  %v1218_v36 = vunpack.i.l.bf16 %v1217_v61 }
 0x1cc   : > { %v1209_v15 = vunpack.i.h.bf16 %v1207_v7  ;;  %v1208_v17 = vunpack.i.l.bf16 %v1207_v7 }
 0x1cd   : > { %v828_v42 = vsel %vm379_vm3, %v820_v39, %v1219_v35  ;;  %v831_v59 = vsel %vm379_vm3, %v823_v41, %v1218_v36 }
 0x1ce   : > { %v853_v24 = vsel %vm850_vm7, %v844_v16, %v1209_v15  ;;  %v856_v25 = vsel %vm850_vm7, %v847_v22, %v1208_v17  ;;  %v836_v31 = vsel %vm400_vm4, %v828_v42, %v1224_v46  ;;  %v839_v54 = vsel %vm400_vm4, %v831_v59, %v1223_v47  ;;  %v978_v41 = vpop.f32.mrf.mxu2 }
 0x1cf   : > { %v862_v27 = vsel %vm859_vm8, %v853_v24, %v1214_v19  ;;  %v865_v21 = vsel %vm859_vm8, %v856_v25, %v1213_v20 }
 0x1d0   : > { %936 = vmatmul.f32.gmra.mxu1 %v862_v27  ;;  %945 = vmatmul.f32.vlgmr.msra.gmra.mxu3 %v865_v21  ;;  %v1266_v21 = vld [vmem:[%s1728_s4] ss:$0 sm:$0xff] }
 0x1d1   : > { %v794_v16 = vpop.permute.xlu2 %793 }
 0x1d2   : > { %v1237_v30 = vpop.permute.xlu1 %1236 }
 0x1d3   : > { %v1227_v33 = vpop.permute.xlu0 %1226  ;;  %v1238_v4 = vunpack.i.l.bf16 %v1237_v30  ;;  %v1239_v6 = vunpack.i.h.bf16 %v1237_v30 }
 0x1d4   : > { %v1229_v44 = vunpack.i.h.bf16 %v1227_v33  ;;  %v1228_v45 = vunpack.i.l.bf16 %v1227_v33 }
 0x1d6   : > { %v845_v57 = vsel %vm841_vm6, %v836_v31, %v1229_v44  ;;  %v848_v58 = vsel %vm841_vm6, %v839_v54, %v1228_v45  ;;  %v981_v42 = vpop.f32.mrf.mxu2 }
 0x1da   : > { %v1242_v50 = vpop.permute.xlu1 %1241 }
 0x1db   : > { %v1244_v10 = vunpack.i.h.bf16 %v1242_v50  ;;  %v1243_v51 = vunpack.i.l.bf16 %v1242_v50  ;;  %v1232_v53 = vpop.permute.xlu0 %1231 }
 0x1dc   : > { %v1234_v55 = vunpack.i.h.bf16 %v1232_v53  ;;  %v1233_v56 = vunpack.i.l.bf16 %v1232_v53 }
 0x1dd   : > { %v854_v60 = vsel %vm850_vm7, %v845_v57, %v1244_v10  ;;  %v857_v62 = vsel %vm850_vm7, %v848_v58, %v1243_v51 }
 0x1de   : > { %v863_v63 = vsel %vm859_vm8, %v854_v60, %v1249_v48  ;;  %v866_v1 = vsel %vm859_vm8, %v857_v62, %v1248_v49  ;;  %v816_v3 = vsel %vm361_vm1, %v1564_v40, %v1233_v56  ;;  %v813_v5 = vsel %vm361_vm1, %v1566_v43, %v1234_v55  ;;  %v984_v59 = vpop.f32.mrf.mxu2 }
 0x1df   : > { %939 = vmatmul.f32.gmra.mxu1 %v863_v63  ;;  %948 = vmatmul.f32.gmra.mxu3 %v866_v1  ;;  %v824_v8 = vsel %vm370_vm2, %v816_v3, %v1238_v4  ;;  %v821_v0 = vsel %vm370_vm2, %v813_v5, %v1239_v6 }
 0x1e0   : > { %v832_v40 = vsel %vm379_vm3, %v824_v8, %v1253_v11  ;;  %v829_v43 = vsel %vm379_vm3, %v821_v0, %v1254_v12 }
 0x1e2   : > { %v1262_v9 = vpop.permute.xlu1 %1261 }
 0x1e3   : > { %v1257_v61 = vpop.permute.xlu0 %1256  ;;  %v1263_v52 = vunpack.i.l.bf16 %v1262_v9  ;;  %v1264_v7 = vunpack.i.h.bf16 %v1262_v9 }
 0x1e4   : > { %v1259_v13 = vunpack.i.h.bf16 %v1257_v61  ;;  %v1258_v14 = vunpack.i.l.bf16 %v1257_v61 }
 0x1e6   : > { %v840_v15 = vsel %vm400_vm4, %v832_v40, %v1258_v14  ;;  %v837_v17 = vsel %vm400_vm4, %v829_v43, %v1259_v13  ;;  %v987_v10 = vpop.f32.mrf.mxu2 }
 0x1e7   : > { %v849_v18 = vsel %vm841_vm6, %v840_v15, %v1263_v52  ;;  %v846_v20 = vsel %vm841_vm6, %v837_v17, %v1264_v7 }
 0x1e8   : > { %v858_v24 = vsel %vm850_vm7, %v849_v18, %v768_v2 }
 0x1ea   : > { %v762_v19 = vpop.permute.xlu1 %761 }
 0x1eb   : > { %v855_v22 = vsel %vm850_vm7, %v846_v20, %v762_v19  ;;  %v800_v23 = vpop.permute.xlu0 %799 }
 0x1ec   : > { %v867_v25 = vsel %vm859_vm8, %v858_v24, %v800_v23  ;;  %v864_v27 = vsel %vm859_vm8, %v855_v22, %v794_v16 }
 0x1ed   : > { %951 = vmatmul.f32.gmra.mxu3 %v867_v25  ;;  %942 = vmatmul.f32.gmra.mxu1 %v864_v27 }
 0x1ee   : > { %v990_v63 = vpop.f32.mrf.mxu2 }
 0x222   : > { %v993_v11 = vpop.f32.mrf.mxu2 }
 0x224   : > { %v931_v29 = vpop.f32.mrf.mxu1 }
 0x225   : > { %v932_v30 = vadd.f32 %v1266_v21, %v931_v29 }
 0x227   : > { %v973_v32 = vadd.f32 %v972_v28, %v932_v30 }
 0x229   : > { %v996_v26 = vmul.f32 0.2, %v973_v32 }
 0x22b   : > { %v1004_v33 = vmax.f32 %v973_v32, %v996_v26 }
 0x22c   : > { %v934_v35 = vpop.f32.mrf.mxu1 }
 0x22d   : > { %1012 = vst [vmem:[%s1711_s21] sm:$0xff] %v1004_v33  ;;  %v935_v36 = vadd.f32 %v1266_v21, %v934_v35 }
 0x22f   : > { %v976_v34 = vadd.f32 %v975_v37, %v935_v36 }
 0x231   : > { %v997_v38 = vmul.f32 0.2, %v976_v34 }
 0x233   : > { %v1005_v39 = vmax.f32 %v976_v34, %v997_v38 }
 0x235   : > { %1013 = vst [vmem:[%s1711_s21 + $0x8] sm:$0xff] %v1005_v39 }
 0x24d   : > { %v937_v44 = vpop.f32.mrf.mxu1 }
 0x24e   : > { %v938_v45 = vadd.f32 %v1266_v21, %v937_v44 }
 0x250   : > { %v979_v46 = vadd.f32 %v978_v41, %v938_v45 }
 0x252   : > { %v998_v47 = vmul.f32 0.2, %v979_v46 }
 0x253   : > { %v946_v48 = vpop.f32.mrf.mxu3 }
 0x254   : > { %v1006_v49 = vmax.f32 %v979_v46, %v998_v47  ;;  %v947_v50 = vadd.f32 %v1266_v21, %v946_v48 }
 0x256   : > { %1014 = vst [vmem:[%s1711_s21 + $0x10] sm:$0xff] %v1006_v49  ;;  %v988_v51 = vadd.f32 %v987_v10, %v947_v50 }
 0x258   : > { %v1001_v53 = vmul.f32 0.2, %v988_v51 }
 0x25a   : > { %v1009_v31 = vmax.f32 %v988_v51, %v1001_v53 }
 0x25c   : > { %1017 = vst [vmem:[%s1711_s21 + $0x28] sm:$0xff] %v1009_v31  ;;  %v940_v54 = vpop.f32.mrf.mxu1 }
 0x25d   : > { %v941_v55 = vadd.f32 %v1266_v21, %v940_v54 }
 0x25f   : > { %v982_v56 = vadd.f32 %v981_v42, %v941_v55 }
 0x261   : > { %v999_v57 = vmul.f32 0.2, %v982_v56 }
 0x262   : > { %v949_v58 = vpop.f32.mrf.mxu3 }
 0x263   : > { %v1007_v60 = vmax.f32 %v982_v56, %v999_v57  ;;  %v950_v62 = vadd.f32 %v1266_v21, %v949_v58 }
 0x265   : > { %1015 = vst [vmem:[%s1711_s21 + $0x18] sm:$0xff] %v1007_v60  ;;  %v991_v1 = vadd.f32 %v990_v63, %v950_v62 }
 0x267   : > { %v1002_v3 = vmul.f32 0.2, %v991_v1 }
 0x269   : > { %v1010_v4 = vmax.f32 %v991_v1, %v1002_v3 }
 0x26a   : > { %v943_v5 = vpop.f32.mrf.mxu1 }
 0x26b   : > { %1018 = vst [vmem:[%s1711_s21 + $0x30] sm:$0xff] %v1010_v4  ;;  %v944_v2 = vadd.f32 %v1266_v21, %v943_v5 }
 0x26d   : > { %v985_v6 = vadd.f32 %v984_v59, %v944_v2 }
 0x26f   : > { %v1000_v8 = vmul.f32 0.2, %v985_v6 }
 0x270   : > { %v952_v9 = vpop.f32.mrf.mxu3 }
 0x271   : > { %v1008_v0 = vmax.f32 %v985_v6, %v1000_v8  ;;  %v953_v61 = vadd.f32 %v1266_v21, %v952_v9 }
 0x273   : > { %1016 = vst [vmem:[%s1711_s21 + $0x20] sm:$0xff] %v1008_v0  ;;  %v994_v12 = vadd.f32 %v993_v11, %v953_v61 }
 0x275   : > { %v1003_v52 = vmul.f32 0.2, %v994_v12 }
 0x277   : > { %v1011_v13 = vmax.f32 %v994_v12, %v1003_v52 }
 0x279   : > { %1019 = vst [vmem:[%s1711_s21 + $0x38] sm:$0xff] %v1011_v13 }
 0x27a PF: > { %s15_s18 = sadd.s32 1, %s1273_s18  }
 0x27b   : > { %p12_p4 = scmp.ge.s32.totalorder %s15_s18, 4  }
 0x27d   :  { %14 = sbr.rel (!%p12_p4) target bundleno = 1 (0x1), region = 72 }

</bundles_post_ra>
